<compile_context>
chip_gen: v7x
topology: tpu7x:2x2x1
jax: 0.10.0
libtpu: 0.0.40
codegen_flags: <defaults>
</compile_context>

<pallas_src>
import functools
from typing import NamedTuple

import jax
import jax.numpy as jnp
from jax.experimental import pallas as pl
from jax.experimental.pallas import tpu as pltpu

_LANES = 128        # lane width / max supported layer width
_SEG_ROWS = 160     # rows per packed segment: 128 weight rows + bias row + pad
_BIAS_ROW = 128     # bias row index inside a segment
_O1, _O2, _O3 = 0, _SEG_ROWS, 2 * _SEG_ROWS
_SLAB_ROWS = 3 * _SEG_ROWS


def _round_up(n, m):
    return (n + m - 1) // m * m


class PackedDQN(NamedTuple):
    """Packed, TPU-resident parameters (built once, reused every forward)."""
    slab: jax.Array      # (_SLAB_ROWS, 128) lane-dense weights + biases
    in_dim: int
    fc1: int
    fc2: int
    num_actions: int


def pack_params(params, *, compute_dtype=jnp.bfloat16):
    """Pack all weights/biases into one lane-dense (480, 128) slab.

    Called ONCE at init / after each optimizer step -- not per forward call.
    Layout per 160-row segment: 128x128 zero-padded weight block (rows
    [0:K], cols [0:N] real), bias in row 128, everything else zero.  The
    policy and valueScalers heads are fused column-wise.
    """
    w1, b1, w2, b2, wp, bp, wv, bv = params
    in_dim, fc1 = w1.shape
    fc2 = w2.shape[1]
    num_actions = wv.shape[1]
    head_out = 3 * num_actions
    assert max(in_dim, fc1, fc2, head_out) <= _LANES, (
        "single-slab packing assumes every layer width <= 128")

    w_head = jnp.concatenate([wp, wv], axis=1)                   # (fc2, 3A)
    b_head = jnp.concatenate([bp.reshape(-1), bv.reshape(-1)])   # (3A,)

    def seg(w, b):
        s = jnp.zeros((_SEG_ROWS, _LANES), jnp.float32)
        s = s.at[: w.shape[0], : w.shape[1]].set(w.astype(jnp.float32))
        s = s.at[_BIAS_ROW, : w.shape[1]].set(b.reshape(-1).astype(jnp.float32))
        return s

    slab = jnp.concatenate(
        [seg(w1, b1), seg(w2, b2), seg(w_head, b_head)], axis=0
    ).astype(compute_dtype)
    return PackedDQN(slab=slab, in_dim=in_dim, fc1=fc1, fc2=fc2,
                     num_actions=num_actions)


def _dqn_kernel(x_ref, w_ref, out_ref, *, in_dim):
    """fc1+ReLU -> fc2+ReLU -> fused (policy || valueScalers) head.

    x_ref:   (TB, in_dim) f32
    w_ref:   (_SLAB_ROWS, 128) packed weights+biases (MXU-operand dtype)
    out_ref: (TB, 128) lane-dense fused head output
    """
    cdt = w_ref.dtype            # MXU operand dtype (bf16 by default)
    f32 = jnp.float32
    x = x_ref[...].astype(cdt)

    # fc1 + ReLU  (K = in_dim, N = 128; cols beyond fc1 are zero)
    w1 = w_ref[_O1:_O1 + in_dim, :]
    b1 = w_ref[_O1 + _BIAS_ROW:_O1 + _BIAS_ROW + 1, :].astype(f32)
    h1 = jnp.maximum(jnp.dot(x, w1, preferred_element_type=f32) + b1, 0.0)

    # fc2 + ReLU  (full 128x128 block; zero rows/cols contribute nothing)
    w2 = w_ref[_O2:_O2 + _LANES, :]
    b2 = w_ref[_O2 + _BIAS_ROW:_O2 + _BIAS_ROW + 1, :].astype(f32)
    h2 = jnp.maximum(
        jnp.dot(h1.astype(cdt), w2, preferred_element_type=f32) + b2, 0.0)

    # fused heads: cols [0:2A] policy, [2A:3A] valueScalers, rest zero
    w3 = w_ref[_O3:_O3 + _LANES, :]
    b3 = w_ref[_O3 + _BIAS_ROW:_O3 + _BIAS_ROW + 1, :].astype(f32)
    y = jnp.dot(h2.astype(cdt), w3, preferred_element_type=f32) + b3

    out_ref[...] = y.astype(out_ref.dtype)


def _cost_estimate(batch, in_dim, slab, out_dtype):
    flops = 2 * batch * (in_dim * _LANES + 2 * _LANES * _LANES)
    bytes_accessed = (batch * in_dim * 4
                      + slab.size * slab.dtype.itemsize
                      + batch * _LANES * jnp.dtype(out_dtype).itemsize)
    return pl.CostEstimate(flops=flops, transcendentals=0,
                           bytes_accessed=bytes_accessed)


def deep_q_network_forward(x, packed, *, out_dtype=jnp.bfloat16,
                           max_tile_b=1024, small_batch_max=256):
    """x: (B, in_dim). Returns (policy (B,2,A), valueScalers (B,A)) like torch."""
    slab, in_dim, num_actions = packed.slab, packed.in_dim, packed.num_actions
    batch = x.shape[0]
    x = x.astype(jnp.float32)   # operands are cast to bf16 inside the kernel
    kernel = functools.partial(_dqn_kernel, in_dim=in_dim)

    if batch <= small_batch_max:
        # Acting path: single VMEM-resident block, no grid, no padding.
        out = pl.pallas_call(
            kernel,
            out_shape=jax.ShapeDtypeStruct((batch, _LANES), out_dtype),
            in_specs=[
                pl.BlockSpec(memory_space=pltpu.MemorySpace.VMEM),
                pl.BlockSpec(memory_space=pltpu.MemorySpace.VMEM),
            ],
            out_specs=pl.BlockSpec(memory_space=pltpu.MemorySpace.VMEM),
            cost_estimate=_cost_estimate(batch, in_dim, slab, out_dtype),
        )(x, slab)
    else:
        # Replay-buffer path: batch-tiled grid, weights stay resident.
        # Cap the tile so the grid always has >=2 tiles (v7x: two TensorCores
        # split the "parallel" axis), but never below 256 (per-step overhead).
        tile_b = max(256, min(max_tile_b, _round_up(-(-batch // 2), 256)))
        b_pad = _round_up(batch, tile_b)
        n_tiles = b_pad // tile_b
        if b_pad != batch:
            x = jnp.pad(x, ((0, b_pad - batch), (0, 0)))

        out_itemsize = jnp.dtype(out_dtype).itemsize
        slab_bytes = slab.size * slab.dtype.itemsize
        vmem_budget = int(
            2 * (tile_b * in_dim * 4 + tile_b * _LANES * out_itemsize)
            + 2 * slab_bytes + (2 << 20))   # tight real footprint + headroom

        out = pl.pallas_call(
            kernel,
            out_shape=jax.ShapeDtypeStruct((b_pad, _LANES), out_dtype),
            grid=(n_tiles,),
            in_specs=[
                pl.BlockSpec((tile_b, in_dim), lambda i: (i, 0)),
                pl.BlockSpec(slab.shape, lambda i: (0, 0)),
            ],
            out_specs=pl.BlockSpec((tile_b, _LANES), lambda i: (i, 0)),
            compiler_params=pltpu.CompilerParams(
                dimension_semantics=("parallel",),
                vmem_limit_bytes=vmem_budget,
            ),
            cost_estimate=_cost_estimate(b_pad, in_dim, slab, out_dtype),
        )(x, slab)

    out = out[:batch]
    # Matches torch: self.policy(x).view(batchSize, 2, numActions)
    policy = out[:, : 2 * num_actions].astype(jnp.float32)
    policy = policy.reshape(batch, 2, num_actions)
    values = out[:, 2 * num_actions: 3 * num_actions].astype(jnp.float32)
    return policy, values


def init_params(key, in_dim, fc1_size, fc2_size, num_actions):
    """Deterministic synthetic init (PyTorch Linear-style uniform bounds)."""
    def linear(k, fan_in, fan_out):
        kw, kb = jax.random.split(k)
        bound = 1.0 / jnp.sqrt(jnp.float32(fan_in))
        w = jax.random.uniform(kw, (fan_in, fan_out), jnp.float32, -bound, bound)
        b = jax.random.uniform(kb, (1, fan_out), jnp.float32, -bound, bound)
        return w, b

    k1, k2, k3, k4 = jax.random.split(key, 4)
    w1, b1 = linear(k1, in_dim, fc1_size)
    w2, b2 = linear(k2, fc1_size, fc2_size)
    wp, bp = linear(k3, fc2_size, num_actions * 2)
    wv, bv = linear(k4, fc2_size, num_actions)
    return (w1, b1, w2, b2, wp, bp, wv, bv)


def _reference_forward(x, params):
    w1, b1, w2, b2, wp, bp, wv, bv = params
    h1 = jnp.maximum(x @ w1 + b1, 0.0)
    h2 = jnp.maximum(h1 @ w2 + b2, 0.0)
    policy = (h2 @ wp + bp).reshape(x.shape[0], 2, wv.shape[1])
    values = h2 @ wv + bv
    return policy, values


if __name__ == "__main__":
    # LunarLander-ish small shapes: obs dim 8, hidden 32/32, 4 actions.
    in_dim, fc1_size, fc2_size, num_actions = 8, 32, 32, 4

    key = jax.random.PRNGKey(0)
    kx, kx2, kp = jax.random.split(key, 3)
    params = init_params(kp, in_dim, fc1_size, fc2_size, num_actions)
    packed = pack_params(params)   # packed ONCE (hoisted out of the call path)

    # ---- Small (acting) batch -> gridless, latency path --------------------
    batch = 2
    x = jax.random.normal(kx, (batch, in_dim), jnp.float32)
    policy, value_scalers = deep_q_network_forward(x, packed)
    jax.block_until_ready((policy, value_scalers))

    ref_policy, ref_values = _reference_forward(x, params)
    assert policy.shape == (batch, 2, num_actions)
    assert value_scalers.shape == (batch, num_actions)
    # bf16 matmul operands + bf16 output -> loosened tolerance vs f32 ref.
    assert jnp.allclose(policy, ref_policy, atol=5e-2, rtol=5e-2)
    assert jnp.allclose(value_scalers, ref_values, atol=5e-2, rtol=5e-2)

    # ---- Larger (replay) batch -> batch-tiled grid path (>=2 tiles) --------
    big_batch = 512
    xb = jax.random.normal(kx2, (big_batch, in_dim), jnp.float32)
    policy_b, values_b = deep_q_network_forward(xb, packed)
    jax.block_until_ready((policy_b, values_b))

    ref_policy_b, ref_values_b = _reference_forward(xb, params)
    assert policy_b.shape == (big_batch, 2, num_actions)
    assert values_b.shape == (big_batch, num_actions)
    assert jnp.allclose(policy_b, ref_policy_b, atol=5e-2, rtol=5e-2)
    assert jnp.allclose(values_b, ref_values_b, atol=5e-2, rtol=5e-2)

    print("KERNEL_OK")
</pallas_src>

<mosaic_0001>
module attributes {stable_mosaic.version = 11 : i64} {
  func.func @_dqn_kernel(%arg0: memref<2x8xf32, #tpu.memory_space<vmem>>, %arg1: memref<480x128xbf16, #tpu.memory_space<vmem>>, %arg2: memref<2x128xbf16, #tpu.memory_space<vmem>>) attributes {dimension_semantics = [], scalar_prefetch = 0 : i64, scratch_operands = 0 : i64, tpu.core_type = #tpu.core_type<tc>} {
    %c0 = arith.constant 0 : index
    %c0_0 = arith.constant 0 : index
    %0 = vector.load %arg0[%c0, %c0_0] : memref<2x8xf32, #tpu.memory_space<vmem>>, vector<2x8xf32>
    %1 = arith.truncf %0 : vector<2x8xf32> to vector<2x8xbf16>
    %c0_1 = arith.constant 0 : index
    %c0_2 = arith.constant 0 : index
    %2 = vector.load %arg1[%c0_1, %c0_2] : memref<480x128xbf16, #tpu.memory_space<vmem>>, vector<8x128xbf16>
    %c128 = arith.constant 128 : index
    %c0_3 = arith.constant 0 : index
    %3 = vector.load %arg1[%c128, %c0_3] : memref<480x128xbf16, #tpu.memory_space<vmem>>, vector<1x128xbf16>
    %4 = arith.extf %3 : vector<1x128xbf16> to vector<1x128xf32>
    %cst = arith.constant dense<0.000000e+00> : vector<2x128xf32>
    %5 = tpu.matmul %1, %2, %cst {dimension_numbers = #tpu.dot_dimension_numbers<[1], [0], [0], [1], [0, 0, 1, 1], [], []>} : vector<2x8xbf16>, vector<8x128xbf16>, vector<2x128xf32> -> vector<2x128xf32>
    %6 = vector.broadcast %4 : vector<1x128xf32> to vector<2x128xf32>
    %7 = arith.addf %5, %6 : vector<2x128xf32>
    %cst_4 = arith.constant 0.000000e+00 : f32
    %8 = vector.broadcast %cst_4 : f32 to vector<2x128xf32>
    %9 = arith.maximumf %7, %8 : vector<2x128xf32>
    %c160 = arith.constant 160 : index
    %c0_5 = arith.constant 0 : index
    %10 = vector.load %arg1[%c160, %c0_5] : memref<480x128xbf16, #tpu.memory_space<vmem>>, vector<128x128xbf16>
    %c288 = arith.constant 288 : index
    %c0_6 = arith.constant 0 : index
    %11 = vector.load %arg1[%c288, %c0_6] : memref<480x128xbf16, #tpu.memory_space<vmem>>, vector<1x128xbf16>
    %12 = arith.extf %11 : vector<1x128xbf16> to vector<1x128xf32>
    %13 = arith.truncf %9 : vector<2x128xf32> to vector<2x128xbf16>
    %cst_7 = arith.constant dense<0.000000e+00> : vector<2x128xf32>
    %14 = tpu.matmul %13, %10, %cst_7 {dimension_numbers = #tpu.dot_dimension_numbers<[1], [0], [0], [1], [0, 0, 1, 1], [], []>} : vector<2x128xbf16>, vector<128x128xbf16>, vector<2x128xf32> -> vector<2x128xf32>
    %15 = vector.broadcast %12 : vector<1x128xf32> to vector<2x128xf32>
    %16 = arith.addf %14, %15 : vector<2x128xf32>
    %cst_8 = arith.constant 0.000000e+00 : f32
    %17 = vector.broadcast %cst_8 : f32 to vector<2x128xf32>
    %18 = arith.maximumf %16, %17 : vector<2x128xf32>
    %c320 = arith.constant 320 : index
    %c0_9 = arith.constant 0 : index
    %19 = vector.load %arg1[%c320, %c0_9] : memref<480x128xbf16, #tpu.memory_space<vmem>>, vector<128x128xbf16>
    %c448 = arith.constant 448 : index
    %c0_10 = arith.constant 0 : index
    %20 = vector.load %arg1[%c448, %c0_10] : memref<480x128xbf16, #tpu.memory_space<vmem>>, vector<1x128xbf16>
    %21 = arith.extf %20 : vector<1x128xbf16> to vector<1x128xf32>
    %22 = arith.truncf %18 : vector<2x128xf32> to vector<2x128xbf16>
    %cst_11 = arith.constant dense<0.000000e+00> : vector<2x128xf32>
    %23 = tpu.matmul %22, %19, %cst_11 {dimension_numbers = #tpu.dot_dimension_numbers<[1], [0], [0], [1], [0, 0, 1, 1], [], []>} : vector<2x128xbf16>, vector<128x128xbf16>, vector<2x128xf32> -> vector<2x128xf32>
    %24 = vector.broadcast %21 : vector<1x128xf32> to vector<2x128xf32>
    %25 = arith.addf %23, %24 : vector<2x128xf32>
    %26 = arith.truncf %25 : vector<2x128xf32> to vector<2x128xbf16>
    %c0_12 = arith.constant 0 : index
    %c0_13 = arith.constant 0 : index
    %27 = vector.load %arg2[%c0_12, %c0_13] : memref<2x128xbf16, #tpu.memory_space<vmem>>, vector<2x128xbf16>
    tpu.vector_store %arg2[%c0_12, %c0_13], %26 {strides = array<i32>} : memref<2x128xbf16, #tpu.memory_space<vmem>>, vector<2x128xbf16>,
    return
  }
}

</mosaic_0001>

<bundles_post_ra>
// kernel: tpu_custom_call.1
= control target key start
LH: loop header
LB: loop body
LE: loop exit
PB: predicated region body
PF: predicated region fallthrough
CT: control target
= control target key end

     0   :  { %7 = vsyncpa [#allocation3], 0  ;;  %s604_s0 = inlined_call_operand.hbm [shape: f32[2,8], index: 0, kind: input, shape index: {}]   ;;  %s605_s1 = inlined_call_operand.hbm [shape: bf16[480,128], index: 1, kind: input, shape index: {}]   ;;  %s606_s2 = inlined_call_operand.hbm [shape: bf16[2,128], index: 2, kind: output, shape index: {}]  }
   0x1   :  { %8 = vsyncpa [#allocation6], 0 }
   0x2   :  { %9 = vsyncpa [#allocation4], 0  ;;  %s516_s9 = smov [#allocation2]   ;;  %s517_s11 = smov [#allocation5]  }
   0x3   :  { %s16_s10 = sshll.u32 %s516_s9, 4  ;;  %s25_s12 = sshll.u32 %s517_s11, 4  ;;  %s17_s10 = int_to_ptr.vmem [resolvable:$true] %s16_s10  ;;  %s538_s12 = int_to_ptr.vmem [resolvable:$true] %s25_s12 }
   0x4   :  { %s444_s15 = scalar_lea.hbm %s604_s0, 32 }
   0x5   :  { %p445_p0 = scmp.ne.s32.totalorder %s604_s0, %s444_s15  ;;  %p448_p1 = scmp.lt.u32.totalorder %s444_s15, %s604_s0 }
   0x7   :  { %p450_p2 = pnand %p448_p1, %p445_p0 }
   0x9   :  { %453 = shalt.err (!%p450_p2)
}
   0xa   :  { %s454_s20 = scalar_lea.vmem %s17_s10, 32  ;;  %p459_p4 = scmp.lt.s32.totalorder %s17_s10, %s17_s10 }
   0xb   :  { %p455_p3 = scmp.ne.s32.totalorder %s17_s10, %s454_s20  ;;  %p460_p5 = scmp.lt.s32.totalorder %s454_s20, %s454_s20 }
   0xd   :  { %p461_p6 = por %p460_p5, %p459_p4 }
   0xf   :  { %p462_p7 = pnand %p461_p6, %p455_p3 }
  0x11   :  { %465 = shalt.err (!%p462_p7)
}
  0x12   :  { %19 = dma.hbm_to_vmem [thread:$0]  %s604_s0, 32, %s17_s10, [#allocation3]  }
  0x13   :  { %s466_s25 = scalar_lea.hbm %s605_s1, 3840 }
  0x14   :  { %p467_p8 = scmp.ne.s32.totalorder %s605_s1, %s466_s25  ;;  %p470_p9 = scmp.lt.u32.totalorder %s466_s25, %s605_s1 }
  0x16   :  { %p472_p10 = pnand %p470_p9, %p467_p8 }
  0x18   :  { %475 = shalt.err (!%p472_p10)
}
  0x19   :  { %s476_s30 = scalar_lea.vmem %s538_s12, 3840  ;;  %p481_p12 = scmp.lt.s32.totalorder %s538_s12, %s538_s12 }
  0x1a   :  { %p477_p11 = scmp.ne.s32.totalorder %s538_s12, %s476_s30  ;;  %p482_p13 = scmp.lt.s32.totalorder %s476_s30, %s476_s30 }
  0x1c   :  { %p483_p0 = por %p482_p13, %p481_p12 }
  0x1e   :  { %p484_p1 = pnand %p483_p0, %p477_p11 }
  0x20   :  { %487 = shalt.err (!%p484_p1)
}
  0x21   :  { %s518_s0 = smov 64   ;;  %s519_s3 = smov 4  }
  0x22   :  { %31 = dma.hbm_to_vmem [thread:$0]  %s605_s1, 3840, %s538_s12, [#allocation6], %s518_s0, %s518_s0, %s519_s3  }
  0x23   :  { %510 = dma.done.wait [#allocation3], 32  }
  0x24   :  { %511 = vsyncadd [#allocation3], 4294967264 }
  0x25   :  { %512 = dma.done.wait [#allocation6], 3840  }
  0x26   :  { %513 = vsyncadd [#allocation6], 4294963456  ;;  %v520_v0 = vmov 0.0   ;;  %vm521_vm0 = vmmov 0   ;;  %vm52_vm1 = vcmask 1043456   ;;  %v428_v5 = vld [vmem:[#allocation5 + $0x50] sm:$0xff]   ;;  %v44_v19 = vlaneseq }
  0x27   :  { %375 = vmatprep.subr.bf16.mxu0 %v520_v0  ;;  %377 = vmatprep.mubr.msk.bf16.mxu0 %vm521_vm0, %v520_v0  ;;  %v41_v1 = vld [vmem:[#allocation5] sm:$0xf]  ;;  %v39_v2 = vld [vmem:[#allocation2] sm:$0x3]  ;;  %vm48_vm2 = vcmask 64512   ;;  %v431_v8 = vld [vmem:[#allocation5 + $0x68] sm:$0xff]  }
  0x28   :  { %381 = vmatprep.subr.bf16.mxu1 %v520_v0  ;;  %397 = vmatprep.mubr.msk.bf16.mxu1 %vm521_vm0, %v520_v0  ;;  %v54_v3 = vsel %vm52_vm1, %v41_v1, 0  ;;  %v40_v4 = vpack.c.bf16 %v39_v2, %v39_v2  ;;  %v429_v6 = vld [vmem:[#allocation5 + $0x58] sm:$0xff]   ;;  %v430_v7 = vld [vmem:[#allocation5 + $0x60] sm:$0xff]   ;;  %v432_v9 = vld [vmem:[#allocation5 + $0x70] sm:$0xff]   ;;  %v45_v20 = vshrl.u32 %v44_v19, 7  ;;  %s522_s1 = smov [#allocation7]  }
  0x29   :  { %376 = vmatpush3.bf16.msra.mxu0 %v54_v3  ;;  %382 = vmatpush3.bf16.msra.mxu1 %v428_v5  ;;  %v433_v10 = vld [vmem:[#allocation5 + $0x78] sm:$0xff]   ;;  %v434_v11 = vld [vmem:[#allocation5 + $0x80] sm:$0xff]   ;;  %v435_v12 = vld [vmem:[#allocation5 + $0x88] sm:$0xff]   ;;  %s328_s6 = sshll.u32 %s522_s1, 4  ;;  %s329_s6 = int_to_ptr.vmem [resolvable:$true] %s328_s6 }
  0x2a   :  { %401 = vmatprep.subr.bf16.mxu0 %v520_v0  ;;  %383 = vmatprep.subr.bf16.mxu1 %v520_v0  ;;  %v436_v13 = vld [vmem:[#allocation5 + $0xa0] sm:$0xff]   ;;  %v437_v14 = vld [vmem:[#allocation5 + $0xa8] sm:$0xff]   ;;  %v438_v15 = vld [vmem:[#allocation5 + $0xb0] sm:$0xff]   ;;  %v46_v23 = vsub.s32 0, %v45_v20  ;;  %s488_s7 = scalar_lea.vmem %s329_s6, 16  ;;  %s492_s8 = scalar_lea.vmem %s329_s6, 32 }
  0x2b   :  { %v439_v16 = vld [vmem:[#allocation5 + $0xb8] sm:$0xff]   ;;  %v440_v17 = vld [vmem:[#allocation5 + $0xc0] sm:$0xff]   ;;  %v441_v18 = vld [vmem:[#allocation5 + $0xc8] sm:$0xff]   ;;  %p489_p2 = scmp.ne.s32.totalorder %s329_s6, %s488_s7  ;;  %p493_p3 = scmp.lt.s32.totalorder %s329_s6, %s329_s6 }
  0x2c   :  { %378 = vmatmul.mubr.msk.bf16.vlgmr.msra.gmra.mrb[0].mxu0 %vm48_vm2, %v40_v4  ;;  %v42_v21 = vld [vmem:[#allocation5 + $0x40] sm:$0x1]  ;;  %v442_v32 = vld [vmem:[#allocation5 + $0xd0] sm:$0xff]   ;;  %v443_v33 = vld [vmem:[#allocation5 + $0xd8] sm:$0xff]   ;;  %p494_p4 = scmp.lt.s32.totalorder %s492_s8, %s488_s7 }
  0x2d   :  { %417 = vmatprep.mubr.msk.bf16.mxu0 %vm521_vm0, %v520_v0  ;;  %384 = vmatpush3.bf16.msra.mxu1 %v429_v6  ;;  %v43_v22 = vunpack.c.l.bf16 %v42_v21  ;;  %v113_v34 = vld [vmem:[#allocation5 + $0x90] sm:$0x1]  ;;  %v225_v44 = vld [vmem:[#allocation5 + $0xe0] sm:$0x1] }
  0x2e   :  { %385 = vmatprep.subr.bf16.mxu1 %v520_v0  ;;  %402 = vmatpush3.bf16.msra.mxu0 %v436_v13  ;;  %v114_v35 = vunpack.c.l.bf16 %v113_v34  ;;  %v226_v45 = vunpack.c.l.bf16 %v225_v44  ;;  %p495_p5 = por %p494_p4, %p493_p3 }
  0x2f   :  { %403 = vmatprep.subr.bf16.mxu0 %v520_v0  ;;  %v47_v24 = vrot.slane %v43_v22, %v46_v23 }
  0x30   :  { %v119_v36 = vrot.slane %v114_v35, %v46_v23  ;;  %v231_v46 = vrot.slane %v226_v45, %v46_v23  ;;  %p496_p6 = pnand %p495_p5, %p489_p2 }
  0x31   :  { %386 = vmatpush3.bf16.msra.mxu1 %v430_v7 }
  0x32   :  { %387 = vmatprep.subr.bf16.mxu1 %v520_v0  ;;  %404 = vmatpush3.bf16.msra.mxu0 %v437_v14 }
  0x33   :  { %405 = vmatprep.subr.bf16.mxu0 %v520_v0 }
  0x35   :  { %388 = vmatpush3.bf16.msra.mxu1 %v431_v8 }
  0x36   :  { %389 = vmatprep.subr.bf16.mxu1 %v520_v0  ;;  %406 = vmatpush3.bf16.msra.mxu0 %v438_v15 }
  0x37   :  { %407 = vmatprep.subr.bf16.mxu0 %v520_v0 }
  0x39   :  { %390 = vmatpush3.bf16.msra.mxu1 %v432_v9 }
  0x3a   :  { %391 = vmatprep.subr.bf16.mxu1 %v520_v0  ;;  %408 = vmatpush3.bf16.msra.mxu0 %v439_v16 }
  0x3b   :  { %409 = vmatprep.subr.bf16.mxu0 %v520_v0 }
  0x3d   :  { %392 = vmatpush3.bf16.msra.mxu1 %v433_v10 }
  0x3e   :  { %393 = vmatprep.subr.bf16.mxu1 %v520_v0  ;;  %410 = vmatpush3.bf16.msra.mxu0 %v440_v17 }
  0x3f   :  { %411 = vmatprep.subr.bf16.mxu0 %v520_v0 }
  0x41   :  { %394 = vmatpush3.bf16.msra.mxu1 %v434_v11 }
  0x42   :  { %395 = vmatprep.subr.bf16.mxu1 %v520_v0  ;;  %412 = vmatpush3.bf16.msra.mxu0 %v441_v18 }
  0x43   :  { %413 = vmatprep.subr.bf16.mxu0 %v520_v0 }
  0x45   :  { %396 = vmatpush3.bf16.msra.mxu1 %v435_v12 }
  0x46   :  { %414 = vmatpush3.bf16.msra.mxu0 %v442_v32 }
  0x47   :  { %415 = vmatprep.subr.bf16.mxu0 %v520_v0 }
  0x4a   :  { %416 = vmatpush3.bf16.msra.mxu0 %v443_v33 }
  0xff   :  { %v90_v25 = vpop.f32.mrb[0].mxu0 }
 0x100   :  { %v91_v26 = vadd.f32 %v90_v25, %v47_v24  ;;  %v379_v27 = vpop.f32.mrb[1].mxu0 }
 0x101   :  { %v93_v28 = vpop.f32.mrb[2].mxu0 }
 0x102   :  { %v96_v29 = vmax.f32 %v91_v26, 0.0  ;;  %v380_v30 = vpop.f32.mrb[3].mxu0 }
 0x104   :  { %v115_v31 = vpack.c.bf16 %v96_v29, %v96_v29 }
 0x106   :  { %398 = vmatmul.mubr.bf16.vlgmr.msra.gmra.mrb[0].mxu1 %v115_v31 }
 0x1d9   :  { %v202_v37 = vpop.f32.mrb[0].mxu1 }
 0x1da   :  { %v203_v38 = vadd.f32 %v202_v37, %v119_v36  ;;  %v399_v39 = vpop.f32.mrb[1].mxu1 }
 0x1db   :  { %v205_v40 = vpop.f32.mrb[2].mxu1 }
 0x1dc   :  { %v208_v41 = vmax.f32 %v203_v38, 0.0  ;;  %v400_v42 = vpop.f32.mrb[3].mxu1 }
 0x1de   :  { %v227_v43 = vpack.c.bf16 %v208_v41, %v208_v41 }
 0x1e0   :  { %418 = vmatmul.mubr.bf16.vlgmr.msra.gmra.mrb[4].mxu0 %v227_v43 }
 0x2b3   :  { %v314_v47 = vpop.f32.mrb[4].mxu0 }
 0x2b4   :  { %v315_v48 = vadd.f32 %v314_v47, %v231_v46  ;;  %v419_v49 = vpop.f32.mrb[5].mxu0 }
 0x2b5   :  { %v317_v50 = vpop.f32.mrb[6].mxu0 }
 0x2b6   :  { %v320_v51 = vpack.c.bf16 %v315_v48, %v315_v48  ;;  %v420_v52 = vpop.f32.mrb[7].mxu0 }
 0x2b8   :  { %321 = vst [vmem:[#allocation7] sm:$0x1] %v320_v51 }
 0x2b9   :  { %499 = shalt.err (!%p496_p6)
}
 0x2ba   :  { %s500_s11 = scalar_lea.hbm %s606_s2, 16 }
 0x2bb   :  { %p501_p7 = scmp.ne.s32.totalorder %s606_s2, %s500_s11  ;;  %p504_p8 = scmp.lt.u32.totalorder %s500_s11, %s606_s2 }
 0x2bd   :  { %p506_p9 = pnand %p504_p8, %p501_p7 }
 0x2bf   :  { %509 = shalt.err (!%p506_p9)
}
 0x2c0   :  { %331 = dma.vmem_to_hbm [thread:$0]  %s329_s6, 16, %s606_s2, [#allocation4]  }
 0x2c1   :  { %514 = dma.done.wait [#allocation4], 16  }
 0x2c2   :  { %515 = vsyncadd [#allocation4], 4294967280 }
 0x2c3   :  { %335 = vsyncpa [#allocation3], 1 }
 0x2c4   :  { %336 = vsyncpa [#allocation6], 1 }
 0x2c5   :  { %337 = vsyncpa [#allocation4], 1 }

</bundles_post_ra>
